<compile_context>
chip_gen: v7x
topology: tpu7x:2x2x1
jax: 0.10.0
libtpu: 0.0.40
codegen_flags: <defaults>
</compile_context>

<pallas_src>
import functools

import jax
import jax.numpy as jnp
from jax import lax
from jax.experimental import pallas as pl
from jax.experimental.pallas import tpu as pltpu


_SUB_ROWS = 512    # in-kernel strip-mine tile (rows); keeps f32 temporaries small
_SMALL_N = 1024    # at/below this, a single (cheaply) padded block is used


def _oe_loss_kernel(x_ref, o_ref, *, sub_rows):
    """x_ref: (RB, C) block of logits.  o_ref: (1, RB) lane-dense per-row loss."""
    rows, c = x_ref.shape
    inv_c = 1.0 / c  # static constant; avoids a per-row divide

    def process(start, size):
        # Transpose before the f32 upcast (less XLU traffic for bf16 inputs).
        # The sample axis lands on lanes, so the sublane reductions below
        # directly produce the lane-dense (1, size) output slab.
        xt = x_ref[pl.ds(start, size), :].T.astype(jnp.float32)   # (C, size)
        # Numerically stable logsumexp over the class (sublane) axis.
        m = jnp.max(xt, axis=0, keepdims=True)                    # (1, size)
        e = jnp.exp(xt - m)
        sum_e = jnp.sum(e, axis=0, keepdims=True)                 # (1, size)
        sum_x = jnp.sum(xt, axis=0, keepdims=True)                # (1, size)
        lse = m + jnp.log(sum_e)
        # -log_softmax(x).mean(-1) == logsumexp(x) - mean(x)
        o_ref[:, pl.ds(start, size)] = (lse - sum_x * inv_c).astype(o_ref.dtype)

    n_full = rows // sub_rows
    if n_full <= 4:
        # Short static loop: scheduler gets full visibility.
        for i in range(n_full):
            process(i * sub_rows, sub_rows)
    else:
        def body(i, carry):
            process(pl.multiple_of(i * sub_rows, sub_rows), sub_rows)
            return carry
        lax.fori_loop(0, n_full, body, 0)

    rem = rows % sub_rows
    if rem:
        process(n_full * sub_rows, rem)


def oe_loss(logits: jax.Array, *,
            max_row_block: int = 32768,
            input_block_bytes: int = 8 << 20) -> jax.Array:
    """-log_softmax(logits, axis=1).mean(axis=1) for 2-D logits (N, C)."""
    n, c = logits.shape
    itemsize = jnp.dtype(logits.dtype).itemsize
    # VMEM input buffers are lane-padded to 128 along C (4x blow-up for C=32).
    c_pad = max(pl.cdiv(c, 128) * 128, 128)
    # Sublane alignment for the tiny-N pad (packed dtypes need more rows).
    row_align = 8 if itemsize >= 4 else (16 if itemsize == 2 else 32)

    x = logits
    if n <= _SMALL_N:
        # Tiny problem: pad rows to a sublane multiple (copy is a few KiB) and
        # run one grid step whose block equals the (padded) array dims.
        row_block = max(pl.cdiv(n, row_align) * row_align, row_align)
        if row_block != n:
            x = jnp.pad(x, ((0, row_block - n), (0, 0)))  # zero rows -> log(C), sliced away
        n_rows = row_block
    else:
        # Large problem: NO padding copy (it would add a full extra HBM round
        # trip).  row_block is a multiple of 128; the partial last block is
        # masked by Pallas and its garbage rows never reach the output.
        rows_fit = max(input_block_bytes // (c_pad * itemsize), 128)  # dtype-aware
        row_block = min(max_row_block, rows_fit, n)
        # Keep >=4 reasonably balanced grid steps when N is big enough
        # (v7x has 2 TensorCores sharding the "parallel" axis).
        if n // 4 >= 4096:
            row_block = min(row_block, n // 4)
        row_block = max((row_block // 128) * 128, 128)
        n_rows = n

    grid = (pl.cdiv(n_rows, row_block),)
    sub_rows = min(_SUB_ROWS, row_block)

    # Explicit VMEM budget: double-buffered input + output blocks, plus the
    # per-sub-tile f32 temporaries (transposed copy, exp) and headroom.
    in_buf = row_block * c_pad * itemsize          # lane-padded input block
    out_buf = 8 * row_block * 4                    # (1, RB) f32, sublane-padded
    tmp = sub_rows * c_pad * 4 + 6 * sub_rows * max(c, 8) * 4
    vmem_limit = 2 * (in_buf + out_buf) + tmp + (2 << 20)
    vmem_limit = int(min(max(vmem_limit, 16 << 20), 48 << 20))

    cost = pl.CostEstimate(
        flops=5 * n * c,
        transcendentals=n * c + n,
        bytes_accessed=n * c * itemsize + n * 4,
    )

    kernel = functools.partial(_oe_loss_kernel, sub_rows=sub_rows)

    out = pl.pallas_call(
        kernel,
        out_shape=jax.ShapeDtypeStruct((1, n_rows), jnp.float32),
        grid=grid,
        in_specs=[pl.BlockSpec((row_block, c), lambda i: (i, 0))],
        # Lane-dense output: each grid step writes a (1, row_block) slab.
        out_specs=pl.BlockSpec((1, row_block), lambda i: (0, i)),
        compiler_params=pltpu.CompilerParams(
            dimension_semantics=("parallel",),
            vmem_limit_bytes=vmem_limit,
        ),
        cost_estimate=cost,
    )(x)
    return out[0, :n]  # (N,)


def _reference(logits):
    # Pure-JAX reference matching the PyTorch module exactly.
    return -jax.nn.log_softmax(logits.astype(jnp.float32), axis=1).mean(axis=1)


if __name__ == "__main__":
    key = jax.random.PRNGKey(0)
    # Small shape consistent with the module: batch N=8, classes C=32.
    logits = jax.random.normal(key, (8, 32), dtype=jnp.float32)

    result = oe_loss(logits)
    jax.block_until_ready(result)

    expected = _reference(logits)
    assert result.shape == expected.shape == (8,)
    assert jnp.allclose(result, expected, atol=1e-5, rtol=1e-5), (result, expected)

    # Ragged N + bf16 input (exercises the tiny-N sublane pad and in-kernel upcast).
    logits_bf16 = jax.random.normal(
        jax.random.PRNGKey(1), (10, 32), dtype=jnp.float32).astype(jnp.bfloat16)
    result2 = oe_loss(logits_bf16)
    jax.block_until_ready(result2)
    expected2 = _reference(logits_bf16)
    assert result2.shape == (10,)
    assert jnp.allclose(result2, expected2, atol=1e-4, rtol=1e-4), (result2, expected2)

    # Larger ragged N: multi-step no-pad path with strip-mined compute and a
    # masked partial last block.
    logits_big = jax.random.normal(jax.random.PRNGKey(2), (3000, 32), dtype=jnp.float32)
    result3 = oe_loss(logits_big)
    jax.block_until_ready(result3)
    expected3 = _reference(logits_big)
    assert result3.shape == (3000,)
    assert jnp.allclose(result3, expected3, atol=1e-5, rtol=1e-5)

    print("KERNEL_OK")
</pallas_src>

<mosaic_0001>
module attributes {stable_mosaic.version = 11 : i64} {
  func.func @_oe_loss_kernel(%arg0: i32, %arg1: memref<8x32xf32, #tpu.memory_space<vmem>>, %arg2: memref<1x8xf32, #tpu.memory_space<vmem>>) attributes {dimension_semantics = [#tpu.dimension_semantics<parallel>], iteration_bounds = array<i64: 1>, scalar_prefetch = 0 : i64, scratch_operands = 0 : i64, tpu.core_type = #tpu.core_type<tc>, window_params = [{transform_indices = @transform_0, window_bounds = array<i64: 8, 32>}, {transform_indices = @transform_1, window_bounds = array<i64: 1, 8>}]} {
    %c0 = arith.constant 0 : index
    %c0_0 = arith.constant 0 : index
    %0 = vector.load %arg1[%c0, %c0_0] : memref<8x32xf32, #tpu.memory_space<vmem>>, vector<8x32xf32>
    %1 = tpu.transpose %0, [1, 0] : vector<8x32xf32> -> vector<32x8xf32>
    %cst = arith.constant dense<0xFF800000> : vector<8xf32>
    %2 = vector.multi_reduction <maximumf>, %1, %cst [0] : vector<32x8xf32> to vector<8xf32>
    %3 = vector.shape_cast %2 : vector<8xf32> to vector<1x8xf32>
    %4 = vector.broadcast %3 : vector<1x8xf32> to vector<32x8xf32>
    %5 = arith.subf %1, %4 : vector<32x8xf32>
    %6 = math.exp %5 : vector<32x8xf32>
    %cst_1 = arith.constant dense<0.000000e+00> : vector<8xf32>
    %7 = vector.multi_reduction <add>, %6, %cst_1 [0] : vector<32x8xf32> to vector<8xf32>
    %8 = vector.shape_cast %7 : vector<8xf32> to vector<1x8xf32>
    %cst_2 = arith.constant dense<0.000000e+00> : vector<8xf32>
    %9 = vector.multi_reduction <add>, %1, %cst_2 [0] : vector<32x8xf32> to vector<8xf32>
    %10 = vector.shape_cast %9 : vector<8xf32> to vector<1x8xf32>
    %11 = math.log %8 : vector<1x8xf32>
    %12 = arith.addf %3, %11 : vector<1x8xf32>
    %cst_3 = arith.constant 3.125000e-02 : f32
    %13 = vector.broadcast %cst_3 : f32 to vector<1x8xf32>
    %14 = arith.mulf %10, %13 : vector<1x8xf32>
    %15 = arith.subf %12, %14 : vector<1x8xf32>
    %c0_4 = arith.constant 0 : index
    %c0_5 = arith.constant 0 : index
    %16 = vector.load %arg2[%c0_4, %c0_5] : memref<1x8xf32, #tpu.memory_space<vmem>>, vector<1x8xf32>
    tpu.vector_store %arg2[%c0_4, %c0_5], %15 {strides = array<i32>} : memref<1x8xf32, #tpu.memory_space<vmem>>, vector<1x8xf32>,
    return
  }
  func.func @transform_0(%arg0: i32) -> (i32, i32) {
    %c0_i32 = arith.constant 0 : i32
    %c0_i32_0 = arith.constant 0 : i32
    return %arg0, %c0_i32 : i32, i32
  }
  func.func @transform_1(%arg0: i32) -> (i32, i32) {
    %c0_i32 = arith.constant 0 : i32
    %c0_i32_0 = arith.constant 0 : i32
    return %c0_i32, %arg0 : i32, i32
  }
}

</mosaic_0001>

<bundles_post_ra>
// kernel: tpu_custom_call.1
= control target key start
LH: loop header
LB: loop body
LE: loop exit
PB: predicated region body
PF: predicated region fallthrough
CT: control target
= control target key end

     0   :  { %6 = vsyncpa [#allocation3], 0  ;;  %s237_s0 = inlined_call_operand.hbm [shape: f32[8,32], index: 0, kind: input, shape index: {}]   ;;  %s238_s1 = inlined_call_operand.hbm [shape: f32[1,8], index: 1, kind: output, shape index: {}]  }
   0x1   :  { %7 = vsyncpa [#allocation4], 0  ;;  %s189_s6 = smov [#allocation2]   ;;  %s141_s10 = scalar_lea.hbm %s237_s0, 128 }
   0x2   :  { %s14_s7 = sshll.u32 %s189_s6, 4  ;;  %p142_p0 = scmp.ne.s32.totalorder %s237_s0, %s141_s10  ;;  %s15_s7 = int_to_ptr.vmem [resolvable:$true] %s14_s7 }
   0x3   :  { %p145_p1 = scmp.lt.u32.totalorder %s141_s10, %s237_s0 }
   0x5   :  { %p147_p2 = pnand %p145_p1, %p142_p0 }
   0x7   :  { %150 = shalt.err (!%p147_p2)
}
   0x8   :  { %s151_s15 = scalar_lea.vmem %s15_s7, 128  ;;  %p156_p4 = scmp.lt.s32.totalorder %s15_s7, %s15_s7 }
   0x9   :  { %p152_p3 = scmp.ne.s32.totalorder %s15_s7, %s151_s15  ;;  %p157_p5 = scmp.lt.s32.totalorder %s151_s15, %s151_s15 }
   0xb   :  { %p158_p6 = por %p157_p5, %p156_p4 }
   0xd   :  { %p159_p7 = pnand %p158_p6, %p152_p3 }
   0xf   :  { %162 = shalt.err (!%p159_p7)
}
  0x10   :  { %17 = dma.hbm_to_vmem [thread:$0]  %s237_s0, 128, %s15_s7, [#allocation3]  }
  0x11   :  { %185 = dma.done.wait [#allocation3], 128  }
  0x12   :  { %186 = vsyncadd [#allocation3], 4294967168  ;;  %v21_v0 = vld [vmem:[#allocation2] sm:$0xff]  ;;  %vm54_vm0 = vcmask 64512   ;;  %s190_s0 = smov [#allocation5]   ;;  %vm111_vm1 = vcmask 57344  }
  0x13   :  { %22 = vxpose.xlu0.b32.start.end [1/1] (short) (narrow) %v21_v0, 32  ;;  %s119_s18 = sshll.u32 %s190_s0, 4  ;;  %s120_s18 = int_to_ptr.vmem [resolvable:$true] %s119_s18 }
  0x14   :  { %s163_s19 = scalar_lea.vmem %s120_s18, 16  ;;  %s167_s20 = scalar_lea.vmem %s120_s18, 32 }
  0x15   :  { %p164_p8 = scmp.ne.s32.totalorder %s120_s18, %s163_s19  ;;  %p168_p9 = scmp.lt.s32.totalorder %s120_s18, %s120_s18 }
  0x16   :  { %p169_p10 = scmp.lt.s32.totalorder %s167_s20, %s163_s19 }
  0x18   :  { %p170_p11 = por %p169_p10, %p168_p9 }
  0x1a   :  { %p171_p12 = pnand %p170_p11, %p164_p8 }
  0x93   :  { %v38_v1 = vpop.trf.xlu0 }
  0x94   :  { %v55_v6 = vsel %vm54_vm0, %v38_v1, -inf  ;;  %v93_v29 = vsel %vm54_vm0, %v38_v1, 0.0 }
  0x97   :  { %v39_v2 = vpop.trf.xlu0 }
  0x98   :  { %v56_v4 = vsel %vm54_vm0, %v39_v2, -inf  ;;  %v94_v26 = vsel %vm54_vm0, %v39_v2, 0.0 }
  0x99   :  { %v59_v9 = vmax.f32 %v55_v6, %v56_v4  ;;  %v95_v33 = vadd.f32 %v94_v26, %v93_v29 }
  0x9b   :  { %v40_v3 = vpop.trf.xlu0 }
  0x9c   :  { %v57_v7 = vsel %vm54_vm0, %v40_v3, -inf  ;;  %v96_v30 = vsel %vm54_vm0, %v40_v3, 0.0 }
  0x9d   :  { %v97_v38 = vadd.f32 %v96_v30, %v95_v33 }
  0x9f   :  { %v41_v5 = vpop.trf.xlu0 }
  0xa0   :  { %v58_v8 = vsel %vm54_vm0, %v41_v5, -inf  ;;  %v98_v37 = vsel %vm54_vm0, %v41_v5, 0.0 }
  0xa1   :  { %v60_v10 = vmax.f32 %v57_v7, %v58_v8  ;;  %v99_v42 = vadd.f32 %v98_v37, %v97_v38 }
  0xa3   :  { %v61_v11 = vmax.f32 %v59_v9, %v60_v10  ;;  %v100_v45 = vrot.slane %v99_v42, 4 }
  0xa5   :  { %v62_v12 = vrot.slane %v61_v11, 4  ;;  %v101_v48 = vadd.f32 %v100_v45, %v99_v42 }
  0xa7   :  { %v63_v13 = vmax.f32 %v61_v11, %v62_v12  ;;  %v102_v51 = vrot.slane %v101_v48, 2 }
  0xa9   :  { %v64_v14 = vrot.slane %v63_v13, 2  ;;  %v103_v53 = vadd.f32 %v102_v51, %v101_v48 }
  0xab   :  { %v65_v15 = vmax.f32 %v63_v13, %v64_v14  ;;  %v104_v54 = vrot.slane %v103_v53, 1 }
  0xad   :  { %v66_v16 = vrot.slane %v65_v15, 1  ;;  %v105_v55 = vadd.f32 %v104_v54, %v103_v53 }
  0xaf   :  { %v67_v17 = vmax.f32 %v65_v15, %v66_v16  ;;  %v109_v59 = vmul.f32 0.03125, %v105_v55 }
  0xb1   :  { %v68_v18 = vsub.f32 %v38_v1, %v67_v17  ;;  %v69_v19 = vsub.f32 %v39_v2, %v67_v17  ;;  %v70_v20 = vsub.f32 %v40_v3, %v67_v17  ;;  %v71_v21 = vsub.f32 %v41_v5, %v67_v17 }
  0xb3   :  { %v72_v22 = vmul.f32 1.442695, %v68_v18  ;;  %v74_v23 = vmul.f32 1.442695, %v69_v19  ;;  %v76_v24 = vmul.f32 1.442695, %v70_v20 }
  0xb4   :  { %v78_v25 = vmul.f32 1.442695, %v71_v21 }
  0xb5   :  { %131 = vpow2.f32 %v72_v22 }
  0xb6   :  { %133 = vpow2.f32 %v74_v23 }
  0xb7   :  { %135 = vpow2.f32 %v76_v24 }
  0xb8   :  { %137 = vpow2.f32 %v78_v25 }
  0xbf   :  { %v132_v27 = vpop.eup %131 }
  0xc0   :  { %v134_v28 = vpop.eup %133  ;;  %v80_v31 = vsel %vm54_vm0, %v132_v27, 0.0 }
  0xc1   :  { %v136_v32 = vpop.eup %135  ;;  %v81_v34 = vsel %vm54_vm0, %v134_v28, 0.0 }
  0xc2   :  { %v138_v35 = vpop.eup %137  ;;  %v82_v36 = vadd.f32 %v81_v34, %v80_v31  ;;  %v83_v39 = vsel %vm54_vm0, %v136_v32, 0.0 }
  0xc3   :  { %v85_v41 = vsel %vm54_vm0, %v138_v35, 0.0 }
  0xc4   :  { %v84_v40 = vadd.f32 %v83_v39, %v82_v36 }
  0xc6   :  { %v86_v43 = vadd.f32 %v85_v41, %v84_v40 }
  0xc8   :  { %v87_v44 = vrot.slane %v86_v43, 4 }
  0xca   :  { %v88_v46 = vadd.f32 %v87_v44, %v86_v43 }
  0xcc   :  { %v89_v47 = vrot.slane %v88_v46, 2 }
  0xce   :  { %v90_v49 = vadd.f32 %v89_v47, %v88_v46 }
  0xd0   :  { %v91_v50 = vrot.slane %v90_v49, 1 }
  0xd2   :  { %v92_v52 = vadd.f32 %v91_v50, %v90_v49 }
  0xd4   :  { %139 = vlog2.f32 %v92_v52 }
  0xde   :  { %v140_v56 = vpop.eup %139 }
  0xdf   :  { %v107_v57 = vmul.f32 0.6931472, %v140_v56 }
  0xe1   :  { %v108_v58 = vadd.f32 %v107_v57, %v67_v17 }
  0xe3   :  { %v110_v60 = vsub.f32 %v108_v58, %v109_v59 }
  0xe5   :  { %112 = vst.msk [vmem:[#allocation5] sm:$0x1] %vm111_vm1, %v110_v60 }
  0xe6   :  { %174 = shalt.err (!%p171_p12)
}
  0xe7   :  { %s175_s23 = scalar_lea.hbm %s238_s1, 16 }
  0xe8   :  { %p176_p13 = scmp.ne.s32.totalorder %s238_s1, %s175_s23  ;;  %p179_p0 = scmp.lt.u32.totalorder %s175_s23, %s238_s1 }
  0xea   :  { %p181_p1 = pnand %p179_p0, %p176_p13 }
  0xec   :  { %184 = shalt.err (!%p181_p1)
}
  0xed   :  { %122 = dma.vmem_to_hbm [thread:$0]  %s120_s18, 16, %s238_s1, [#allocation4]  }
  0xee   :  { %187 = dma.done.wait [#allocation4], 16  }
  0xef   :  { %188 = vsyncadd [#allocation4], 4294967280 }
  0xf0   :  { %126 = vsyncpa [#allocation3], 1 }
  0xf1   :  { %127 = vsyncpa [#allocation4], 1 }

</bundles_post_ra>
